<compile_context>
chip_gen: v6e
topology: v6e:2x2x1
jax: 0.10.0
libtpu: 0.0.40
codegen_flags: <defaults>
</compile_context>

<pallas_src>
import functools

import jax
import jax.numpy as jnp
from jax.experimental import pallas as pl
from jax.experimental.pallas import tpu as pltpu

HIDDEN = 64
H_PAD = 128  # lane-dense hidden width inside the kernel


def _round_up(n, m):
    return ((n + m - 1) // m) * m


def _cdiv(a, b):
    return -(-a // b)


def _tpu_generation():
    """Best-effort TPU generation (4/5/6/7); 0 if unknown."""
    try:
        kind = jax.devices()[0].device_kind.lower()
    except Exception:
        return 0
    for g in (7, 6, 5, 4):
        if f"v{g}" in kind:
            return g
    return 0


# --------------------------------------------------------------------------
# Parameter packing (done once, outside the per-step hot path).
# --------------------------------------------------------------------------
def pack_focused_actor_params(params, obs_size, act_size, *,
                              hidden=HIDDEN, h_pad=H_PAD,
                              weight_dtype=jnp.bfloat16):
    """Pack W1/W2/W3 into one lane-dense (obs_pad + 2*h_pad, h_pad) slab of
    `weight_dtype` (bf16 = production path) and b1/b2/b3 into an (8, h_pad)
    f32 slab.  Weights are stored in (in, out) orientation so the kernel does
    x @ W directly."""
    assert hidden <= h_pad and act_size <= h_pad and hidden % 8 == 0
    obs_pad = _round_up(obs_size, 8)

    w_rows = obs_pad + 2 * h_pad
    w_slab = jnp.zeros((w_rows, h_pad), jnp.float32)
    w_slab = w_slab.at[:obs_size, :hidden].set(params["w1"])
    w_slab = w_slab.at[obs_pad:obs_pad + hidden, :hidden].set(params["w2"])
    w_slab = w_slab.at[obs_pad + h_pad:obs_pad + h_pad + hidden,
                       :act_size].set(params["w3"])
    w_slab = w_slab.astype(weight_dtype)

    b_slab = jnp.zeros((8, h_pad), jnp.float32)
    b_slab = b_slab.at[0, :hidden].set(params["b1"].reshape(-1))
    b_slab = b_slab.at[1, :hidden].set(params["b2"].reshape(-1))
    b_slab = b_slab.at[2, :act_size].set(params["b3"].reshape(-1))
    return w_slab, b_slab


# --------------------------------------------------------------------------
# Forward pass.
# --------------------------------------------------------------------------
def focused_actor_forward(x, w_slab, b_slab, obs_size, act_size, *,
                          hidden=HIDDEN, h_pad=H_PAD, tile_b_max=1024,
                          act_dtype=None, even_tiles=None):
    """x: (B, obs_size) f32.  w_slab/b_slab from pack_focused_actor_params.
    Production path uses a bf16 weight slab; pass a f32 slab only for
    exact-check purposes (f32 matmul is a slow multi-pass MXU emulation)."""
    B = x.shape[0]
    assert x.shape == (B, obs_size)
    obs_pad = _round_up(obs_size, 8)
    act_pad = min(h_pad, _round_up(act_size, 8))
    w_rows = obs_pad + 2 * h_pad
    assert w_slab.shape == (w_rows, h_pad)
    assert b_slab.shape == (8, h_pad) and b_slab.dtype == jnp.float32
    assert act_size <= h_pad

    gen = _tpu_generation()
    if act_dtype is None:
        # bf16 bias-add + tanh on v6e/v7x (bf16 EUP); f32 on v5e (no bf16 EUP).
        act_dtype = jnp.bfloat16 if gen >= 6 else jnp.float32
    if even_tiles is None:
        even_tiles = gen >= 7  # v7x: 2 TensorCores split the batch grid

    # Divisor-aware batch tiling: minimise padded rows, keep tile_b % 8 == 0.
    n_tiles = _cdiv(B, tile_b_max)
    if even_tiles and B > 8 and n_tiles % 2 == 1:
        n_tiles += 1
    tile_b = _round_up(_cdiv(B, n_tiles), 8)
    b_pad = n_tiles * tile_b

    # Single cheap pad (batch rows, plus obs lanes only if obs_size % 8 != 0).
    x = x.astype(jnp.float32)
    pad_b, pad_f = b_pad - B, obs_pad - obs_size
    if pad_b or pad_f:
        x_p = jax.lax.pad(x, jnp.array(0.0, jnp.float32),
                          ((0, pad_b, 0), (0, pad_f, 0)))
    else:
        x_p = x

    dot_dtype = w_slab.dtype

    def kernel(w_ref, b_ref, x_ref, o_ref):
        # Params stay VMEM-resident (constant index_map); static slices are
        # sublane-aligned and free.  Weights are already in dot_dtype.
        w1 = w_ref[0:obs_pad, :]
        w2 = w_ref[obs_pad:obs_pad + h_pad, :]
        w3 = w_ref[obs_pad + h_pad:obs_pad + 2 * h_pad, :]
        b1 = b_ref[0:1, :]
        b2 = b_ref[1:2, :]
        b3 = b_ref[2:3, :]

        xb = x_ref[...].astype(dot_dtype)
        # MXU matmuls in dot_dtype with f32 accumulation; bias+tanh in
        # act_dtype (bf16 on v6e/v7x, f32 on v5e / check path).
        a1 = jnp.dot(xb, w1, preferred_element_type=jnp.float32)
        h1 = jnp.tanh((a1 + b1).astype(act_dtype))
        a2 = jnp.dot(h1.astype(dot_dtype), w2, preferred_element_type=jnp.float32)
        h2 = jnp.tanh((a2 + b2).astype(act_dtype))
        a3 = jnp.dot(h2.astype(dot_dtype), w3, preferred_element_type=jnp.float32)
        # Narrow BEFORE bias/tanh/store: only act_pad lanes hit HBM.
        h3 = jnp.tanh((a3[:, :act_pad] + b3[:, :act_pad]).astype(act_dtype))
        o_ref[...] = h3.astype(o_ref.dtype)

    w_itemsize = jnp.dtype(dot_dtype).itemsize
    out_full = pl.pallas_call(
        kernel,
        out_shape=jax.ShapeDtypeStruct((b_pad, act_pad), jnp.float32),
        grid=(n_tiles,),
        in_specs=[
            pl.BlockSpec((w_rows, h_pad), lambda i: (0, 0)),    # weights, resident
            pl.BlockSpec((8, h_pad), lambda i: (0, 0)),         # biases, resident
            pl.BlockSpec((tile_b, obs_pad), lambda i: (i, 0)),  # x batch tile
        ],
        out_specs=pl.BlockSpec((tile_b, act_pad), lambda i: (i, 0)),
        compiler_params=pltpu.CompilerParams(
            dimension_semantics=("parallel",),                  # v7x: both TCs
        ),
        cost_estimate=pl.CostEstimate(
            flops=2 * b_pad * (obs_pad + 2 * h_pad) * h_pad,
            transcendentals=b_pad * (2 * h_pad + act_pad),
            bytes_accessed=(w_rows * h_pad * w_itemsize + 8 * h_pad * 4
                            + b_pad * obs_pad * 4 + b_pad * act_pad * 4),
        ),
    )(w_slab, b_slab, x_p)

    # Strip batch padding / extra action lanes (trivially small slice).
    return out_full[:B, :act_size]


# --------------------------------------------------------------------------
# Init (matches torch.nn.init.xavier_normal_(gain=0.01), zero biases).
# --------------------------------------------------------------------------
def _xavier_normal(key, fan_in, fan_out, gain):
    std = gain * (2.0 / (fan_in + fan_out)) ** 0.5
    # Built directly as (in, out): same distribution; forward uses x @ W.
    return std * jax.random.normal(key, (fan_in, fan_out), dtype=jnp.float32)


def init_focused_actor_params(key, obs_size, act_size):
    k1, k2, k3 = jax.random.split(key, 3)
    gain = 0.01
    return {
        "w1": _xavier_normal(k1, obs_size, HIDDEN, gain),
        "b1": jnp.zeros((HIDDEN,), jnp.float32),
        "w2": _xavier_normal(k2, HIDDEN, HIDDEN, gain),
        "b2": jnp.zeros((HIDDEN,), jnp.float32),
        "w3": _xavier_normal(k3, HIDDEN, act_size, gain),
        "b3": jnp.zeros((act_size,), jnp.float32),
        # TODO(synk): self.logstd exists on the module but forward() never
        # reads it; created here for parity, not consumed by the kernel.
        "logstd": jnp.zeros((act_size,), jnp.float32) - 1.0,
    }


if __name__ == "__main__":
    # LunarLanderContinuous-like sizes: obs=8, act=2.
    obs_size, act_size = 8, 2

    key = jax.random.PRNGKey(0)
    k_params, k_x1, k_x2 = jax.random.split(key, 3)
    params = init_focused_actor_params(k_params, obs_size, act_size)

    def ref_forward(x):  # pure-JAX reference of the same math
        h1 = jnp.tanh(x @ params["w1"] + params["b1"])
        h2 = jnp.tanh(h1 @ params["w2"] + params["b2"])
        return jnp.tanh(h2 @ params["w3"] + params["b3"])

    # 1) Check path: f32 weight slab + f32 activations, tiny batch (1 tile).
    w32, b32 = pack_focused_actor_params(params, obs_size, act_size,
                                         weight_dtype=jnp.float32)
    x_small = jax.random.normal(k_x1, (4, obs_size), dtype=jnp.float32)
    out_f32 = jax.block_until_ready(
        focused_actor_forward(x_small, w32, b32, obs_size, act_size,
                              act_dtype=jnp.float32))
    assert out_f32.shape == (4, act_size)
    assert jnp.allclose(out_f32, ref_forward(x_small), rtol=5e-2, atol=1e-7), \
        "f32 check-path mismatch"

    # 2) Production path: bf16 weight slab, chip-appropriate activation dtype,
    #    multi-tile batch grid (B=1040 -> 2 tiles of 520, zero padded rows).
    wbf, bbf = pack_focused_actor_params(params, obs_size, act_size)  # bf16
    x_big = jax.random.normal(k_x2, (1040, obs_size), dtype=jnp.float32)
    fwd = jax.jit(functools.partial(focused_actor_forward,
                                    obs_size=obs_size, act_size=act_size))
    out_bf = jax.block_until_ready(fwd(x_big, wbf, bbf))
    assert out_bf.shape == (1040, act_size)
    assert jnp.allclose(out_bf, ref_forward(x_big), rtol=5e-2, atol=1e-7), \
        "bf16 production-path mismatch"

    print("KERNEL_OK")
</pallas_src>

<mosaic_0001>
module attributes {stable_mosaic.version = 11 : i64} {
  func.func @kernel(%arg0: i32, %arg1: memref<264x128xf32, #tpu.memory_space<vmem>>, %arg2: memref<8x128xf32, #tpu.memory_space<vmem>>, %arg3: memref<8x8xf32, #tpu.memory_space<vmem>>, %arg4: memref<8x8xf32, #tpu.memory_space<vmem>>) attributes {dimension_semantics = [#tpu.dimension_semantics<parallel>], iteration_bounds = array<i64: 1>, scalar_prefetch = 0 : i64, scratch_operands = 0 : i64, tpu.core_type = #tpu.core_type<tc>, window_params = [{pipeline_mode = #tpu.pipeline_mode<synchronous>, transform_indices = @transform_0, window_bounds = array<i64: 264, 128>}, {pipeline_mode = #tpu.pipeline_mode<synchronous>, transform_indices = @transform_1, window_bounds = array<i64: 8, 128>}, {transform_indices = @transform_2, window_bounds = array<i64: 8, 8>}, {transform_indices = @transform_3, window_bounds = array<i64: 8, 8>}]} {
    %c0 = arith.constant 0 : index
    %c0_0 = arith.constant 0 : index
    %0 = vector.load %arg1[%c0, %c0_0] : memref<264x128xf32, #tpu.memory_space<vmem>>, vector<8x128xf32>
    %c8 = arith.constant 8 : index
    %c0_1 = arith.constant 0 : index
    %1 = vector.load %arg1[%c8, %c0_1] : memref<264x128xf32, #tpu.memory_space<vmem>>, vector<128x128xf32>
    %c136 = arith.constant 136 : index
    %c0_2 = arith.constant 0 : index
    %2 = vector.load %arg1[%c136, %c0_2] : memref<264x128xf32, #tpu.memory_space<vmem>>, vector<128x128xf32>
    %c0_3 = arith.constant 0 : index
    %c0_4 = arith.constant 0 : index
    %3 = vector.load %arg2[%c0_3, %c0_4] : memref<8x128xf32, #tpu.memory_space<vmem>>, vector<1x128xf32>
    %c1 = arith.constant 1 : index
    %c0_5 = arith.constant 0 : index
    %4 = vector.load %arg2[%c1, %c0_5] : memref<8x128xf32, #tpu.memory_space<vmem>>, vector<1x128xf32>
    %c2 = arith.constant 2 : index
    %c0_6 = arith.constant 0 : index
    %5 = vector.load %arg2[%c2, %c0_6] : memref<8x128xf32, #tpu.memory_space<vmem>>, vector<1x128xf32>
    %c0_7 = arith.constant 0 : index
    %c0_8 = arith.constant 0 : index
    %6 = vector.load %arg3[%c0_7, %c0_8] : memref<8x8xf32, #tpu.memory_space<vmem>>, vector<8x8xf32>
    %cst = arith.constant dense<0.000000e+00> : vector<8x128xf32>
    %7 = tpu.matmul %6, %0, %cst {dimension_numbers = #tpu.dot_dimension_numbers<[1], [0], [0], [1], [0, 0, 1, 1], [], []>} : vector<8x8xf32>, vector<8x128xf32>, vector<8x128xf32> -> vector<8x128xf32>
    %8 = vector.broadcast %3 : vector<1x128xf32> to vector<8x128xf32>
    %9 = arith.addf %7, %8 : vector<8x128xf32>
    %10 = math.tanh %9 : vector<8x128xf32>
    %cst_9 = arith.constant dense<0.000000e+00> : vector<8x128xf32>
    %11 = tpu.matmul %10, %1, %cst_9 {dimension_numbers = #tpu.dot_dimension_numbers<[1], [0], [0], [1], [0, 0, 1, 1], [], []>} : vector<8x128xf32>, vector<128x128xf32>, vector<8x128xf32> -> vector<8x128xf32>
    %12 = vector.broadcast %4 : vector<1x128xf32> to vector<8x128xf32>
    %13 = arith.addf %11, %12 : vector<8x128xf32>
    %14 = math.tanh %13 : vector<8x128xf32>
    %cst_10 = arith.constant dense<0.000000e+00> : vector<8x128xf32>
    %15 = tpu.matmul %14, %2, %cst_10 {dimension_numbers = #tpu.dot_dimension_numbers<[1], [0], [0], [1], [0, 0, 1, 1], [], []>} : vector<8x128xf32>, vector<128x128xf32>, vector<8x128xf32> -> vector<8x128xf32>
    %16 = vector.extract_strided_slice %15 {offsets = [0, 0], sizes = [8, 8], strides = [1, 1]} : vector<8x128xf32> to vector<8x8xf32>
    %17 = vector.extract_strided_slice %5 {offsets = [0, 0], sizes = [1, 8], strides = [1, 1]} : vector<1x128xf32> to vector<1x8xf32>
    %18 = vector.broadcast %17 : vector<1x8xf32> to vector<8x8xf32>
    %19 = arith.addf %16, %18 : vector<8x8xf32>
    %20 = math.tanh %19 : vector<8x8xf32>
    %c0_11 = arith.constant 0 : index
    %c0_12 = arith.constant 0 : index
    %21 = vector.load %arg4[%c0_11, %c0_12] : memref<8x8xf32, #tpu.memory_space<vmem>>, vector<8x8xf32>
    tpu.vector_store %arg4[%c0_11, %c0_12], %20 {strides = array<i32>} : memref<8x8xf32, #tpu.memory_space<vmem>>, vector<8x8xf32>,
    return
  }
  func.func @transform_0(%arg0: i32) -> (i32, i32) {
    %c0_i32 = arith.constant 0 : i32
    %c0_i32_0 = arith.constant 0 : i32
    %c0_i32_1 = arith.constant 0 : i32
    return %c0_i32, %c0_i32_0 : i32, i32
  }
  func.func @transform_1(%arg0: i32) -> (i32, i32) {
    %c0_i32 = arith.constant 0 : i32
    %c0_i32_0 = arith.constant 0 : i32
    %c0_i32_1 = arith.constant 0 : i32
    return %c0_i32, %c0_i32_0 : i32, i32
  }
  func.func @transform_2(%arg0: i32) -> (i32, i32) {
    %c0_i32 = arith.constant 0 : i32
    %c0_i32_0 = arith.constant 0 : i32
    return %arg0, %c0_i32 : i32, i32
  }
  func.func @transform_3(%arg0: i32) -> (i32, i32) {
    %c0_i32 = arith.constant 0 : i32
    %c0_i32_0 = arith.constant 0 : i32
    return %arg0, %c0_i32 : i32, i32
  }
}

</mosaic_0001>

<bundles_post_ra>
// kernel: tpu_custom_call.1
= control target key start
LH: loop header
LB: loop body
LE: loop exit
PB: predicated region body
PF: predicated region fallthrough
CT: control target
= control target key end

     0   :  { %8 = vsyncpa [#allocation3], 0  ;;  %s632_s0 = inlined_call_operand.hbm [shape: f32[264,128], index: 0, kind: input, shape index: {}]   ;;  %s633_s1 = inlined_call_operand.hbm [shape: f32[8,128], index: 1, kind: input, shape index: {}]   ;;  %s634_s2 = inlined_call_operand.hbm [shape: f32[8,8], index: 2, kind: input, shape index: {}]   ;;  %s635_s3 = inlined_call_operand.hbm [shape: f32[8,8], index: 3, kind: output, shape index: {}]  }
   0x1   :  { %9 = vsyncpa [#allocation6], 0 }
   0x2   :  { %10 = vsyncpa [#allocation4], 0  ;;  %s551_s12 = smov [#allocation5]   ;;  %s552_s14 = smov [#allocation2]  }
   0x3   :  { %s29_s13 = sshll.u32 %s551_s12, 4  ;;  %s16_s15 = sshll.u32 %s552_s14, 4  ;;  %s30_s13 = int_to_ptr.vmem [resolvable:$true] %s29_s13  ;;  %s17_s15 = int_to_ptr.vmem [resolvable:$true] %s16_s15 }
   0x4   :  { %s473_s16 = scalar_lea.vmem %s30_s13, 128  ;;  %p478_p1 = scmp.lt.s32.totalorder %s30_s13, %s30_s13 }
   0x5   :  { %p474_p0 = scmp.ne.s32.totalorder %s30_s13, %s473_s16  ;;  %p479_p2 = scmp.lt.s32.totalorder %s473_s16, %s473_s16 }
   0x7   :  { %p480_p3 = por %p479_p2, %p478_p1 }
   0x9   :  { %p481_p4 = pnand %p480_p3, %p474_p0 }
   0xb   :  { %484 = shalt.err (!%p481_p4)
}
   0xc   :  { %32 = dma.hbm_to_vmem [thread:$0]  %s633_s1, 128, %s30_s13, [#allocation6]  }
   0xd   :  { %s493_s19 = scalar_lea.vmem %s17_s15, 4224  ;;  %p498_p6 = scmp.lt.s32.totalorder %s17_s15, %s17_s15 }
   0xe   :  { %p494_p5 = scmp.ne.s32.totalorder %s17_s15, %s493_s19  ;;  %p499_p7 = scmp.lt.s32.totalorder %s493_s19, %s493_s19 }
  0x10   :  { %p500_p8 = por %p499_p7, %p498_p6 }
  0x12   :  { %p501_p9 = pnand %p500_p8, %p494_p5 }
  0x14   :  { %504 = shalt.err (!%p501_p9)
}
  0x15   :  { %s553_s20 = smov 128   ;;  %s554_s21 = smov 8  }
  0x16   :  { %22 = dma.hbm_to_vmem [thread:$0]  %s632_s0, 4224, %s17_s15, [#allocation3], %s553_s20, %s553_s20, %s554_s21  }
  0x17   :  { %s555_s24 = smov [#allocation7]  }
  0x18   :  { %s39_s25 = sshll.u32 %s555_s24, 4  ;;  %s40_s25 = int_to_ptr.vmem [resolvable:$true] %s39_s25 }
  0x19   :  { %s513_s26 = scalar_lea.vmem %s40_s25, 128  ;;  %p518_p11 = scmp.lt.s32.totalorder %s40_s25, %s40_s25 }
  0x1a   :  { %p514_p10 = scmp.ne.s32.totalorder %s40_s25, %s513_s26  ;;  %p519_p12 = scmp.lt.s32.totalorder %s513_s26, %s513_s26 }
  0x1c   :  { %p520_p13 = por %p519_p12, %p518_p11 }
  0x1e   :  { %p521_p0 = pnand %p520_p13, %p514_p10 }
  0x20   :  { %524 = shalt.err (!%p521_p0)
}
  0x21   :  { %42 = dma.hbm_to_vmem [thread:$0]  %s634_s2, 128, %s40_s25, [#allocation6]  }
  0x22   :  { %545 = dma.done.wait [#allocation3], 4224  }
  0x23   :  { %546 = vsyncadd [#allocation3], 4294963072 }
  0x24   :  { %547 = dma.done.wait [#allocation6], 256  }
  0x25   :  { %548 = vsyncadd [#allocation6], 4294967040  ;;  %v556_v0 = vmov 0.0   ;;  %vm557_vm0 = vmmov 0   ;;  %vm93_vm1 = vcmask 64512   ;;  %v52_v1 = vld [vmem:[#allocation2] sm:$0xff] }
  0x26   :  { %376 = vmatprep.subr.mxu0 %v556_v0  ;;  %378 = vmatprep.mubr.msk.f32.mxu0 %vm557_vm0, %v556_v0  ;;  %v88_v2 = vld [vmem:[#allocation7] sm:$0xff]  ;;  %v68_v3 = vld [vmem:[#allocation2 + $0x80] sm:$0xff]  ;;  %v67_v4 = vld [vmem:[#allocation2 + $0x78] sm:$0xff]  ;;  %s558_s0 = smov [#allocation8]  }
  0x27   :  { %381 = vmatprep.subr.mxu1 %v556_v0  ;;  %413 = vmatprep.mubr.msk.f32.mxu1 %vm557_vm0, %v556_v0  ;;  %v66_v5 = vld [vmem:[#allocation2 + $0x70] sm:$0xff]  ;;  %v65_v6 = vld [vmem:[#allocation2 + $0x68] sm:$0xff]  ;;  %v64_v7 = vld [vmem:[#allocation2 + $0x60] sm:$0xff]  ;;  %s326_s2 = sshll.u32 %s558_s0, 4  ;;  %s327_s2 = int_to_ptr.vmem [resolvable:$true] %s326_s2 }
  0x28   :  { %377 = vmatpush3.msra.mxu0 %v52_v1  ;;  %382 = vmatpush3.msra.mxu1 %v68_v3  ;;  %v63_v8 = vld [vmem:[#allocation2 + $0x58] sm:$0xff]  ;;  %v62_v9 = vld [vmem:[#allocation2 + $0x50] sm:$0xff]  ;;  %v61_v10 = vld [vmem:[#allocation2 + $0x48] sm:$0xff]  ;;  %s525_s28 = scalar_lea.vmem %s327_s2, 128  ;;  %p530_p2 = scmp.lt.s32.totalorder %s327_s2, %s327_s2 }
  0x29   :  { %379 = vmatmul.mubr.msk.f32.vlgmr.msra.gmra.mxu0 %vm93_vm1, %v88_v2  ;;  %383 = vmatprep.subr.mxu1 %v556_v0  ;;  %v60_v11 = vld [vmem:[#allocation2 + $0x40] sm:$0xff]  ;;  %v59_v12 = vld [vmem:[#allocation2 + $0x38] sm:$0xff]  ;;  %v58_v13 = vld [vmem:[#allocation2 + $0x30] sm:$0xff]  ;;  %p526_p1 = scmp.ne.s32.totalorder %s327_s2, %s525_s28  ;;  %p531_p3 = scmp.lt.s32.totalorder %s525_s28, %s525_s28 }
  0x2a   :  { %384 = vmatpush3.msra.mxu1 %v67_v4  ;;  %416 = vmatprep.subr.mxu0 %v556_v0  ;;  %v57_v14 = vld [vmem:[#allocation2 + $0x28] sm:$0xff]  ;;  %v56_v15 = vld [vmem:[#allocation2 + $0x20] sm:$0xff]  ;;  %v55_v16 = vld [vmem:[#allocation2 + $0x18] sm:$0xff] }
  0x2b   :  { %385 = vmatprep.subr.mxu1 %v556_v0  ;;  %448 = vmatprep.mubr.msk.f32.mxu0 %vm557_vm0, %v556_v0  ;;  %v54_v17 = vld [vmem:[#allocation2 + $0x10] sm:$0xff]  ;;  %v53_v18 = vld [vmem:[#allocation2 + $0x8] sm:$0xff]  ;;  %v84_v19 = vld [vmem:[#allocation2 + $0x100] sm:$0xff]  ;;  %p532_p4 = por %p531_p3, %p530_p2 }
  0x2c   :  { %386 = vmatpush3.msra.mxu1 %v66_v5  ;;  %v83_v20 = vld [vmem:[#allocation2 + $0xf8] sm:$0xff]  ;;  %417 = vmatpush3.msra.mxu0 %v84_v19  ;;  %v82_v21 = vld [vmem:[#allocation2 + $0xf0] sm:$0xff]  ;;  %v81_v22 = vld [vmem:[#allocation2 + $0xe8] sm:$0xff] }
  0x2d   :  { %387 = vmatprep.subr.mxu1 %v556_v0  ;;  %418 = vmatprep.subr.mxu0 %v556_v0  ;;  %v80_v23 = vld [vmem:[#allocation2 + $0xe0] sm:$0xff]  ;;  %v79_v24 = vld [vmem:[#allocation2 + $0xd8] sm:$0xff]  ;;  %v78_v25 = vld [vmem:[#allocation2 + $0xd0] sm:$0xff]  ;;  %p533_p5 = pnand %p532_p4, %p526_p1 }
  0x2e   :  { %388 = vmatpush3.msra.mxu1 %v65_v6  ;;  %419 = vmatpush3.msra.mxu0 %v83_v20  ;;  %v336_v26 = vld [vmem:[#allocation5] ss:$0 sm:$0xff]  ;;  %v76_v32 = vld [vmem:[#allocation2 + $0xc0] sm:$0xff]  ;;  %v75_v33 = vld [vmem:[#allocation2 + $0xb8] sm:$0xff] }
  0x2f   :  { %389 = vmatprep.subr.mxu1 %v556_v0  ;;  %420 = vmatprep.subr.mxu0 %v556_v0  ;;  %v77_v31 = vld [vmem:[#allocation2 + $0xc8] sm:$0xff]  ;;  %v74_v34 = vld [vmem:[#allocation2 + $0xb0] sm:$0xff]  ;;  %v72_v36 = vld [vmem:[#allocation2 + $0xa0] sm:$0xff] }
  0x30   :  { %390 = vmatpush3.msra.mxu1 %v64_v7  ;;  %421 = vmatpush3.msra.mxu0 %v82_v21  ;;  %v73_v35 = vld [vmem:[#allocation2 + $0xa8] sm:$0xff]  ;;  %v71_v37 = vld [vmem:[#allocation2 + $0x98] sm:$0xff]  ;;  %v70_v38 = vld [vmem:[#allocation2 + $0x90] sm:$0xff] }
  0x31   :  { %391 = vmatprep.subr.mxu1 %v556_v0  ;;  %422 = vmatprep.subr.mxu0 %v556_v0  ;;  %v69_v39 = vld [vmem:[#allocation2 + $0x88] sm:$0xff] }
  0x32   :  { %392 = vmatpush3.msra.mxu1 %v63_v8  ;;  %423 = vmatpush3.msra.mxu0 %v81_v22  ;;  %v338_v40 = vld [vmem:[#allocation5 + $0x1] ss:$0 sm:$0xff]  ;;  %v339_v45 = vld [vmem:[#allocation5 + $0x2] ss:$0 sm:$0xff] }
  0x33   :  { %393 = vmatprep.subr.mxu1 %v556_v0  ;;  %424 = vmatprep.subr.mxu0 %v556_v0 }
  0x34   :  { %394 = vmatpush3.msra.mxu1 %v62_v9  ;;  %425 = vmatpush3.msra.mxu0 %v80_v23 }
  0x35   :  { %395 = vmatprep.subr.mxu1 %v556_v0  ;;  %426 = vmatprep.subr.mxu0 %v556_v0 }
  0x36   :  { %396 = vmatpush3.msra.mxu1 %v61_v10  ;;  %427 = vmatpush3.msra.mxu0 %v79_v24 }
  0x37   :  { %397 = vmatprep.subr.mxu1 %v556_v0  ;;  %428 = vmatprep.subr.mxu0 %v556_v0 }
  0x38   :  { %398 = vmatpush3.msra.mxu1 %v60_v11  ;;  %429 = vmatpush3.msra.mxu0 %v78_v25 }
  0x39   :  { %399 = vmatprep.subr.mxu1 %v556_v0  ;;  %430 = vmatprep.subr.mxu0 %v556_v0 }
  0x3a   :  { %400 = vmatpush3.msra.mxu1 %v59_v12  ;;  %431 = vmatpush3.msra.mxu0 %v77_v31 }
  0x3b   :  { %401 = vmatprep.subr.mxu1 %v556_v0  ;;  %432 = vmatprep.subr.mxu0 %v556_v0 }
  0x3c   :  { %402 = vmatpush3.msra.mxu1 %v58_v13  ;;  %433 = vmatpush3.msra.mxu0 %v76_v32 }
  0x3d   :  { %403 = vmatprep.subr.mxu1 %v556_v0  ;;  %434 = vmatprep.subr.mxu0 %v556_v0 }
  0x3e   :  { %404 = vmatpush3.msra.mxu1 %v57_v14  ;;  %435 = vmatpush3.msra.mxu0 %v75_v33 }
  0x3f   :  { %405 = vmatprep.subr.mxu1 %v556_v0  ;;  %436 = vmatprep.subr.mxu0 %v556_v0 }
  0x40   :  { %406 = vmatpush3.msra.mxu1 %v56_v15  ;;  %437 = vmatpush3.msra.mxu0 %v74_v34 }
  0x41   :  { %407 = vmatprep.subr.mxu1 %v556_v0  ;;  %438 = vmatprep.subr.mxu0 %v556_v0 }
  0x42   :  { %408 = vmatpush3.msra.mxu1 %v55_v16  ;;  %439 = vmatpush3.msra.mxu0 %v73_v35 }
  0x43   :  { %409 = vmatprep.subr.mxu1 %v556_v0  ;;  %440 = vmatprep.subr.mxu0 %v556_v0 }
  0x44   :  { %410 = vmatpush3.msra.mxu1 %v54_v17  ;;  %441 = vmatpush3.msra.mxu0 %v72_v36 }
  0x45   :  { %411 = vmatprep.subr.mxu1 %v556_v0  ;;  %442 = vmatprep.subr.mxu0 %v556_v0 }
  0x46   :  { %412 = vmatpush3.msra.mxu1 %v53_v18  ;;  %443 = vmatpush3.msra.mxu0 %v71_v37 }
  0x47   :  { %444 = vmatprep.subr.mxu0 %v556_v0 }
  0x48   :  { %445 = vmatpush3.msra.mxu0 %v70_v38 }
  0x49   :  { %446 = vmatprep.subr.mxu0 %v556_v0 }
  0x4a   :  { %447 = vmatpush3.msra.mxu0 %v69_v39 }
  0xe9   :  { %v163_v27 = vpop.f32.mrf.mxu0 }
  0xea   :  { %v164_v28 = vadd.f32 %v336_v26, %v163_v27 }
  0xeb   :  { %v380_v29 = vpop.f32.mrf.mxu0 }
  0xec   :  { %459 = vtanh.f32 %v164_v28 }
  0xf9   :  { %v460_v30 = vpop.eup %459 }
  0xfa   :  { %414 = vmatmul.mubr.f32.vlgmr.msra.gmra.mxu1 %v460_v30 }
 0x1ba   :  { %v238_v41 = vpop.f32.mrf.mxu1 }
 0x1bb   :  { %v239_v42 = vadd.f32 %v338_v40, %v238_v41 }
 0x1bc   :  { %v415_v43 = vpop.f32.mrf.mxu1 }
 0x1bd   :  { %461 = vtanh.f32 %v239_v42 }
 0x1ca   :  { %v462_v44 = vpop.eup %461 }
 0x1cb   :  { %449 = vmatmul.mubr.f32.vlgmr.msra.gmra.mxu0 %v462_v44 }
 0x28b   :  { %v309_v46 = vpop.f32.mrf.mxu0 }
 0x28c   :  { %v317_v47 = vadd.f32 %v339_v45, %v309_v46 }
 0x28d   :  { %v450_v48 = vpop.f32.mrf.mxu0 }
 0x28e   :  { %463 = vtanh.f32 %v317_v47 }
 0x29b   :  { %v464_v49 = vpop.eup %463 }
 0x29c   :  { %319 = vst.msk [vmem:[#allocation8] sm:$0xff] %vm93_vm1, %v464_v49 }
 0x29d   :  { %536 = shalt.err (!%p533_p5)
}
 0x29e   :  { %329 = dma.vmem_to_hbm [thread:$0]  %s327_s2, 128, %s635_s3, [#allocation4]  }
 0x29f   :  { %549 = dma.done.wait [#allocation4], 128  }
 0x2a0   :  { %550 = vsyncadd [#allocation4], 4294967168 }
 0x2a1   :  { %333 = vsyncpa [#allocation3], 1 }
 0x2a2   :  { %334 = vsyncpa [#allocation6], 1 }
 0x2a3   :  { %335 = vsyncpa [#allocation4], 1 }

</bundles_post_ra>
